<compile_context>
chip_gen: v7x
topology: tpu7x:2x2x1
jax: 0.10.0
libtpu: 0.0.40
codegen_flags: <defaults>
</compile_context>

<pallas_src>
import jax
import jax.numpy as jnp
from jax import lax
from jax.experimental import pallas as pl
from jax.experimental.pallas import tpu as pltpu

IN_FEATURES = 6          # first GINEConv nn: Linear(6, 2*hidden)
HIDDEN = 64              # hidden_channels
OUT_CHANNELS = 2
BN_EPS = 1e-5
EDGE_TILE = 512          # lane-aligned edge tile; amortizes ~0.35us/grid-step


def gin_kernel(ne_ref, eps_ref,                               # SMEM scalars
               xt_ref, x_ref, src_ref, dst_ref, ea_ref,       # VMEM blocks
               pool_ref, wet_ref, bet_ref,
               w1_ref, b1_ref, w2_ref, b2_ref, wl_ref, bl_ref,
               out_ref,                                       # output
               aggr_ref):                                     # VMEM scratch
    f32 = jnp.float32
    step = pl.program_id(0)
    n = xt_ref.shape[1]          # num nodes
    te = src_ref.shape[1]        # edge tile width

    @pl.when(step == 0)
    def _init():
        aggr_ref[...] = jnp.zeros_like(aggr_ref)

    # Skip fully padded edge tiles (actual edge count passed via SMEM).
    @pl.when(step * te < ne_ref[0, 0])
    def _tile():
        # In-kernel one-hot gather/scatter: one VPU iota+compare per tile,
        # then two small MXU matmuls.  Padded edges carry dst == n
        # (out-of-range sentinel) -> all-zero scatter column -> contribute 0.
        node_iota = lax.broadcasted_iota(jnp.int32, (n, te), 0)      # [N, TE]
        gather_oh = (node_iota == src_ref[...]).astype(f32)          # [N, TE]
        scat_oh = (node_iota == dst_ref[...]).astype(f32)            # [N, TE]

        # x_j for every edge of the tile: features on sublanes, edges lane-dense.
        xj_t = jnp.dot(xt_ref[...], gather_oh,
                       preferred_element_type=f32)                   # [F, TE]
        # edge embedding (K=1 linear) as a VPU broadcast multiply.
        edge_emb_t = wet_ref[...] * ea_ref[...] + bet_ref[...]       # [F,1]*[1,TE]+[F,1]
        msg_t = jnp.maximum(xj_t + edge_emb_t, 0.0)                  # [F, TE]

        # scatter-add to destination nodes:
        #   aggr[n, f] += sum_e scat_oh[n, e] * msg_t[f, e]   (NT matmul)
        aggr_ref[...] += lax.dot_general(
            scat_oh, msg_t, (((1,), (1,)), ((), ())),
            preferred_element_type=f32)                              # [N, F]

    # ---- finalize: (1+eps)*x + aggr -> MLP (BN folded) -> pool -> log_softmax
    @pl.when(step == pl.num_programs(0) - 1)
    def _finalize():
        h = (1.0 + eps_ref[0, 0]) * x_ref[...] + aggr_ref[...]       # [N, F]
        h = jnp.maximum(
            jnp.dot(h, w1_ref[...], preferred_element_type=f32) + b1_ref[...],
            0.0)                                                     # [N, 2H]
        h = jnp.maximum(
            jnp.dot(h, w2_ref[...], preferred_element_type=f32) + b2_ref[...],
            0.0)                                                     # [N, H]
        # F.dropout(training=False) -> identity at inference time
        pooled = jnp.dot(pool_ref[...], h, preferred_element_type=f32)   # [G, H]
        logits = jnp.dot(pooled, wl_ref[...],
                         preferred_element_type=f32) + bl_ref[...]       # [G, C]
        m = jnp.max(logits, axis=1, keepdims=True)
        z = logits - m
        out_ref[...] = z - jnp.log(jnp.sum(jnp.exp(z), axis=1, keepdims=True))


def make_params(key):
    ks = jax.random.split(key, 12)
    f32 = jnp.float32

    def lin(kw, kb, fan_in, fan_out):
        bound = 1.0 / jnp.sqrt(fan_in)
        w = jax.random.uniform(kw, (fan_in, fan_out), f32, -bound, bound)
        b = jax.random.uniform(kb, (1, fan_out), f32, -bound, bound)
        return w, b

    def bn(kg, kb, km, kv, c):
        gamma = 1.0 + 0.1 * jax.random.normal(kg, (1, c), f32)
        beta = 0.1 * jax.random.normal(kb, (1, c), f32)
        rmean = 0.1 * jax.random.normal(km, (1, c), f32)
        rvar = jax.random.uniform(kv, (1, c), f32, 0.5, 1.5)
        scale = gamma / jnp.sqrt(rvar + BN_EPS)
        shift = beta - rmean * scale
        return scale, shift

    we, be = lin(ks[0], ks[1], 1, IN_FEATURES)                 # GINEConv.lin
    w1, b1 = lin(ks[2], ks[3], IN_FEATURES, 2 * HIDDEN)
    s1, t1 = bn(*jax.random.split(ks[4], 4), 2 * HIDDEN)
    w2, b2 = lin(ks[5], ks[6], 2 * HIDDEN, HIDDEN)
    s2, t2 = bn(*jax.random.split(ks[7], 4), HIDDEN)
    wl, bl = lin(ks[8], ks[9], HIDDEN, OUT_CHANNELS)
    eps = jnp.array([[0.05]], dtype=f32)                       # GINEConv.eps
    return dict(we=we, be=be, eps=eps, w1=w1, b1=b1, s1=s1, t1=t1,
                w2=w2, b2=b2, s2=s2, t2=t2, wl=wl, bl=bl)


def fold_bn(params):
    """Fold BatchNorm scale/shift into the preceding Linear (host-side)."""
    w1f = params["w1"] * params["s1"]
    b1f = params["b1"] * params["s1"] + params["t1"]
    w2f = params["w2"] * params["s2"]
    b2f = params["b2"] * params["s2"] + params["t2"]
    return w1f, b1f, w2f, b2f


def gin_forward(x, edge_index, edge_attr, batch, num_graphs, params):
    f32 = jnp.float32
    n = x.shape[0]
    e = edge_index.shape[1]
    src = edge_index[0].astype(jnp.int32)
    dst = edge_index[1].astype(jnp.int32)

    # Pad edges to a multiple of EDGE_TILE. src pads with 0 (harmless: masked
    # by zero scatter column); dst pads with n (out-of-range sentinel).
    e_pad = max(EDGE_TILE, ((e + EDGE_TILE - 1) // EDGE_TILE) * EDGE_TILE)
    pad = e_pad - e
    src_p = jnp.pad(src, (0, pad)).reshape(1, e_pad)                      # lane-major
    dst_p = jnp.pad(dst, (0, pad), constant_values=n).reshape(1, e_pad)   # lane-major
    ea_p = jnp.pad(edge_attr[:, 0].astype(f32), (0, pad)).reshape(1, e_pad)

    x32 = x.astype(f32)
    xt = jnp.transpose(x32)                                    # [F, N]
    wet = jnp.transpose(params["we"])                          # [F, 1]
    bet = jnp.transpose(params["be"])                          # [F, 1]

    pool_oh = jnp.transpose(jax.nn.one_hot(batch, num_graphs, dtype=f32))  # [G, N]
    counts = jnp.maximum(jnp.sum(pool_oh, axis=1, keepdims=True), 1.0)
    pool = pool_oh / counts

    w1f, b1f, w2f, b2f = fold_bn(params)
    ne = jnp.array([[e]], dtype=jnp.int32)

    n_tiles = e_pad // EDGE_TILE
    smem = pl.BlockSpec(memory_space=pltpu.MemorySpace.SMEM)

    in_specs = [
        smem,                                                        # ne (edge count)
        smem,                                                        # eps
        pl.BlockSpec((IN_FEATURES, n), lambda k: (0, 0)),            # x^T
        pl.BlockSpec((n, IN_FEATURES), lambda k: (0, 0)),            # x
        pl.BlockSpec((1, EDGE_TILE), lambda k: (0, k)),              # src (lane-major)
        pl.BlockSpec((1, EDGE_TILE), lambda k: (0, k)),              # dst (lane-major)
        pl.BlockSpec((1, EDGE_TILE), lambda k: (0, k)),              # edge_attr (lane-major)
        pl.BlockSpec((num_graphs, n), lambda k: (0, 0)),             # mean-pool
        pl.BlockSpec((IN_FEATURES, 1), lambda k: (0, 0)),            # we^T
        pl.BlockSpec((IN_FEATURES, 1), lambda k: (0, 0)),            # be^T
        pl.BlockSpec((IN_FEATURES, 2 * HIDDEN), lambda k: (0, 0)),   # w1 (BN folded)
        pl.BlockSpec((1, 2 * HIDDEN), lambda k: (0, 0)),             # b1 (BN folded)
        pl.BlockSpec((2 * HIDDEN, HIDDEN), lambda k: (0, 0)),        # w2 (BN folded)
        pl.BlockSpec((1, HIDDEN), lambda k: (0, 0)),                 # b2 (BN folded)
        pl.BlockSpec((HIDDEN, OUT_CHANNELS), lambda k: (0, 0)),      # wl
        pl.BlockSpec((1, OUT_CHANNELS), lambda k: (0, 0)),           # bl
    ]
    out_specs = pl.BlockSpec((num_graphs, OUT_CHANNELS), lambda k: (0, 0))
    scratch_shapes = [
        pltpu.VMEM((n, IN_FEATURES), f32),           # aggregation accumulator
    ]

    args = (ne, params["eps"], xt, x32, src_p, dst_p, ea_p, pool,
            wet, bet, w1f, b1f, w2f, b2f, params["wl"], params["bl"])

    # TODO(synk): v7x could use its 2nd TensorCore via an outer "parallel"
    # node-block axis (per-core aggr slabs + epilogue on core 0); the edge
    # axis here is a reduction ("arbitrary") so it stays on one TC.
    # TODO(synk): for large num_graphs, compute logits into a 128-lane-padded
    # slab and slice outside the kernel (lane-dense stores); negligible at G=2.
    return pl.pallas_call(
        gin_kernel,
        out_shape=jax.ShapeDtypeStruct((num_graphs, OUT_CHANNELS), f32),
        grid=(n_tiles,),
        in_specs=in_specs,
        out_specs=out_specs,
        scratch_shapes=scratch_shapes,
        compiler_params=pltpu.CompilerParams(
            dimension_semantics=("arbitrary",),
            vmem_limit_bytes=32 * 1024 * 1024),
    )(*args)


def gin_reference(x, edge_index, edge_attr, batch, num_graphs, params):
    # Pure-JAX reference (unfolded BN) for silent self-check.
    src, dst = edge_index[0], edge_index[1]
    edge_emb = edge_attr @ params["we"] + params["be"]
    msg = jnp.maximum(x[src] + edge_emb, 0.0)
    aggr = jnp.zeros_like(x).at[dst].add(msg)
    h = (1.0 + params["eps"][0, 0]) * x + aggr
    h = jnp.maximum((h @ params["w1"] + params["b1"]) * params["s1"] + params["t1"], 0.0)
    h = jnp.maximum((h @ params["w2"] + params["b2"]) * params["s2"] + params["t2"], 0.0)
    pool_oh = jnp.transpose(jax.nn.one_hot(batch, num_graphs, dtype=x.dtype))
    pooled = (pool_oh @ h) / jnp.maximum(pool_oh.sum(axis=1, keepdims=True), 1.0)
    logits = pooled @ params["wl"] + params["bl"]
    return jax.nn.log_softmax(logits, axis=1)


if __name__ == "__main__":
    key = jax.random.PRNGKey(0)
    k_x, k_ea, k_src, k_dst, k_p = jax.random.split(key, 5)

    N, E, G = 16, 40, 2
    x = jax.random.normal(k_x, (N, IN_FEATURES), jnp.float32)
    edge_attr = jax.random.normal(k_ea, (E, 1), jnp.float32)
    src = jax.random.randint(k_src, (E,), 0, N)
    dst = jax.random.randint(k_dst, (E,), 0, N)
    edge_index = jnp.stack([src, dst], axis=0)                 # [2, E]
    batch = jnp.concatenate([jnp.zeros(N // 2, jnp.int32),
                             jnp.ones(N - N // 2, jnp.int32)])  # [N]

    params = make_params(k_p)

    out = gin_forward(x, edge_index, edge_attr, batch, G, params)
    out = jax.block_until_ready(out)

    ref = gin_reference(x, edge_index, edge_attr, batch, G, params)
    assert out.shape == (G, OUT_CHANNELS)
    assert jnp.allclose(out, ref, atol=2e-4, rtol=2e-4)

    print("KERNEL_OK")
</pallas_src>

<mosaic_0001>
module attributes {stable_mosaic.version = 11 : i64} {
  func.func @gin_kernel(%arg0: i32, %arg1: memref<1x1xi32, #tpu.memory_space<smem>>, %arg2: memref<1x1xf32, #tpu.memory_space<smem>>, %arg3: memref<6x16xf32, #tpu.memory_space<vmem>>, %arg4: memref<16x6xf32, #tpu.memory_space<vmem>>, %arg5: memref<1x512xi32, #tpu.memory_space<vmem>>, %arg6: memref<1x512xi32, #tpu.memory_space<vmem>>, %arg7: memref<1x512xf32, #tpu.memory_space<vmem>>, %arg8: memref<2x16xf32, #tpu.memory_space<vmem>>, %arg9: memref<6x1xf32, #tpu.memory_space<vmem>>, %arg10: memref<6x1xf32, #tpu.memory_space<vmem>>, %arg11: memref<6x128xf32, #tpu.memory_space<vmem>>, %arg12: memref<1x128xf32, #tpu.memory_space<vmem>>, %arg13: memref<128x64xf32, #tpu.memory_space<vmem>>, %arg14: memref<1x64xf32, #tpu.memory_space<vmem>>, %arg15: memref<64x2xf32, #tpu.memory_space<vmem>>, %arg16: memref<1x2xf32, #tpu.memory_space<vmem>>, %arg17: memref<2x2xf32, #tpu.memory_space<vmem>>, %arg18: memref<16x6xf32, #tpu.memory_space<vmem>>) attributes {dimension_semantics = [#tpu.dimension_semantics<arbitrary>], iteration_bounds = array<i64: 1>, scalar_prefetch = 0 : i64, scratch_operands = 1 : i64, tpu.core_type = #tpu.core_type<tc>, window_params = [{transform_indices = @transform_0, window_bounds = array<i64: 1, 1>}, {transform_indices = @transform_1, window_bounds = array<i64: 1, 1>}, {pipeline_mode = #tpu.pipeline_mode<synchronous>, transform_indices = @transform_2, window_bounds = array<i64: 6, 16>}, {pipeline_mode = #tpu.pipeline_mode<synchronous>, transform_indices = @transform_3, window_bounds = array<i64: 16, 6>}, {transform_indices = @transform_4, window_bounds = array<i64: 1, 512>}, {transform_indices = @transform_5, window_bounds = array<i64: 1, 512>}, {transform_indices = @transform_6, window_bounds = array<i64: 1, 512>}, {pipeline_mode = #tpu.pipeline_mode<synchronous>, transform_indices = @transform_7, window_bounds = array<i64: 2, 16>}, {pipeline_mode = #tpu.pipeline_mode<synchronous>, transform_indices = @transform_8, window_bounds = array<i64: 6, 1>}, {pipeline_mode = #tpu.pipeline_mode<synchronous>, transform_indices = @transform_9, window_bounds = array<i64: 6, 1>}, {pipeline_mode = #tpu.pipeline_mode<synchronous>, transform_indices = @transform_10, window_bounds = array<i64: 6, 128>}, {pipeline_mode = #tpu.pipeline_mode<synchronous>, transform_indices = @transform_11, window_bounds = array<i64: 1, 128>}, {pipeline_mode = #tpu.pipeline_mode<synchronous>, transform_indices = @transform_12, window_bounds = array<i64: 128, 64>}, {pipeline_mode = #tpu.pipeline_mode<synchronous>, transform_indices = @transform_13, window_bounds = array<i64: 1, 64>}, {pipeline_mode = #tpu.pipeline_mode<synchronous>, transform_indices = @transform_14, window_bounds = array<i64: 64, 2>}, {pipeline_mode = #tpu.pipeline_mode<synchronous>, transform_indices = @transform_15, window_bounds = array<i64: 1, 2>}, {pipeline_mode = #tpu.pipeline_mode<synchronous>, transform_indices = @transform_16, window_bounds = array<i64: 2, 2>}]} {
    %c0_i32 = arith.constant 0 : i32
    %0 = arith.cmpi eq, %arg0, %c0_i32 : i32
    %1 = arith.extui %0 : i1 to i32
    %c0_i32_0 = arith.constant 0 : i32
    %2 = arith.cmpi ne, %1, %c0_i32_0 : i32
    scf.if %2 {
      %cst = arith.constant 0.000000e+00 : f32
      %11 = vector.broadcast %cst : f32 to vector<16x6xf32>
      %c0_5 = arith.constant 0 : index
      %c0_6 = arith.constant 0 : index
      %12 = vector.load %arg18[%c0_5, %c0_6] : memref<16x6xf32, #tpu.memory_space<vmem>>, vector<16x6xf32>
      tpu.vector_store %arg18[%c0_5, %c0_6], %11 {strides = array<i32>} : memref<16x6xf32, #tpu.memory_space<vmem>>, vector<16x6xf32>,
    } else {
    }
    %c512_i32 = arith.constant 512 : i32
    %3 = arith.muli %arg0, %c512_i32 : i32
    %c0 = arith.constant 0 : index
    %c0_1 = arith.constant 0 : index
    %4 = memref.load %arg1[%c0, %c0_1] : memref<1x1xi32, #tpu.memory_space<smem>>
    %5 = arith.cmpi slt, %3, %4 : i32
    %6 = arith.extui %5 : i1 to i32
    %c0_i32_2 = arith.constant 0 : i32
    %7 = arith.cmpi ne, %6, %c0_i32_2 : i32
    scf.if %7 {
      %11 = tpu.iota {dimensions = array<i32: 0>} : vector<16x512xi32>
      %c0_5 = arith.constant 0 : index
      %c0_6 = arith.constant 0 : index
      %12 = vector.load %arg5[%c0_5, %c0_6] : memref<1x512xi32, #tpu.memory_space<vmem>>, vector<1x512xi32>
      %13 = vector.broadcast %12 : vector<1x512xi32> to vector<16x512xi32>
      %14 = arith.cmpi eq, %11, %13 : vector<16x512xi32>
      %15 = arith.extui %14 : vector<16x512xi1> to vector<16x512xi32>
      %16 = arith.sitofp %15 : vector<16x512xi32> to vector<16x512xf32>
      %c0_7 = arith.constant 0 : index
      %c0_8 = arith.constant 0 : index
      %17 = vector.load %arg6[%c0_7, %c0_8] : memref<1x512xi32, #tpu.memory_space<vmem>>, vector<1x512xi32>
      %18 = vector.broadcast %17 : vector<1x512xi32> to vector<16x512xi32>
      %19 = arith.cmpi eq, %11, %18 : vector<16x512xi32>
      %20 = arith.extui %19 : vector<16x512xi1> to vector<16x512xi32>
      %21 = arith.sitofp %20 : vector<16x512xi32> to vector<16x512xf32>
      %c0_9 = arith.constant 0 : index
      %c0_10 = arith.constant 0 : index
      %22 = vector.load %arg3[%c0_9, %c0_10] : memref<6x16xf32, #tpu.memory_space<vmem>>, vector<6x16xf32>
      %cst = arith.constant dense<0.000000e+00> : vector<6x512xf32>
      %23 = tpu.matmul %22, %16, %cst {dimension_numbers = #tpu.dot_dimension_numbers<[1], [0], [0], [1], [0, 0, 1, 1], [], []>} : vector<6x16xf32>, vector<16x512xf32>, vector<6x512xf32> -> vector<6x512xf32>
      %c0_11 = arith.constant 0 : index
      %c0_12 = arith.constant 0 : index
      %24 = vector.load %arg9[%c0_11, %c0_12] : memref<6x1xf32, #tpu.memory_space<vmem>>, vector<6x1xf32>
      %c0_13 = arith.constant 0 : index
      %c0_14 = arith.constant 0 : index
      %25 = vector.load %arg7[%c0_13, %c0_14] : memref<1x512xf32, #tpu.memory_space<vmem>>, vector<1x512xf32>
      %26 = vector.broadcast %24 : vector<6x1xf32> to vector<6x512xf32>
      %27 = vector.broadcast %25 : vector<1x512xf32> to vector<6x512xf32>
      %28 = arith.mulf %26, %27 : vector<6x512xf32>
      %c0_15 = arith.constant 0 : index
      %c0_16 = arith.constant 0 : index
      %29 = vector.load %arg10[%c0_15, %c0_16] : memref<6x1xf32, #tpu.memory_space<vmem>>, vector<6x1xf32>
      %30 = vector.broadcast %29 : vector<6x1xf32> to vector<6x512xf32>
      %31 = arith.addf %28, %30 : vector<6x512xf32>
      %32 = arith.addf %23, %31 : vector<6x512xf32>
      %cst_17 = arith.constant 0.000000e+00 : f32
      %33 = vector.broadcast %cst_17 : f32 to vector<6x512xf32>
      %34 = arith.maximumf %32, %33 : vector<6x512xf32>
      %c0_18 = arith.constant 0 : index
      %c0_19 = arith.constant 0 : index
      %35 = vector.load %arg18[%c0_18, %c0_19] : memref<16x6xf32, #tpu.memory_space<vmem>>, vector<16x6xf32>
      %cst_20 = arith.constant dense<0.000000e+00> : vector<16x6xf32>
      %36 = tpu.matmul %21, %34, %cst_20 {dimension_numbers = #tpu.dot_dimension_numbers<[1], [1], [0], [0], [0, 0, 1, 0], [], []>} : vector<16x512xf32>, vector<6x512xf32>, vector<16x6xf32> -> vector<16x6xf32>
      %37 = arith.addf %35, %36 : vector<16x6xf32>
      %c0_21 = arith.constant 0 : index
      %c0_22 = arith.constant 0 : index
      %38 = vector.load %arg18[%c0_21, %c0_22] : memref<16x6xf32, #tpu.memory_space<vmem>>, vector<16x6xf32>
      tpu.vector_store %arg18[%c0_21, %c0_22], %37 {strides = array<i32>} : memref<16x6xf32, #tpu.memory_space<vmem>>, vector<16x6xf32>,
    } else {
    }
    %c0_i32_3 = arith.constant 0 : i32
    %8 = arith.cmpi eq, %arg0, %c0_i32_3 : i32
    %9 = arith.extui %8 : i1 to i32
    %c0_i32_4 = arith.constant 0 : i32
    %10 = arith.cmpi ne, %9, %c0_i32_4 : i32
    scf.if %10 {
      %c0_5 = arith.constant 0 : index
      %c0_6 = arith.constant 0 : index
      %11 = memref.load %arg2[%c0_5, %c0_6] : memref<1x1xf32, #tpu.memory_space<smem>>
      %cst = arith.constant 1.000000e+00 : f32
      %12 = arith.addf %cst, %11 : f32
      %c0_7 = arith.constant 0 : index
      %c0_8 = arith.constant 0 : index
      %13 = vector.load %arg4[%c0_7, %c0_8] : memref<16x6xf32, #tpu.memory_space<vmem>>, vector<16x6xf32>
      %14 = vector.broadcast %12 : f32 to vector<16x6xf32>
      %15 = arith.mulf %14, %13 : vector<16x6xf32>
      %c0_9 = arith.constant 0 : index
      %c0_10 = arith.constant 0 : index
      %16 = vector.load %arg18[%c0_9, %c0_10] : memref<16x6xf32, #tpu.memory_space<vmem>>, vector<16x6xf32>
      %17 = arith.addf %15, %16 : vector<16x6xf32>
      %c0_11 = arith.constant 0 : index
      %c0_12 = arith.constant 0 : index
      %18 = vector.load %arg11[%c0_11, %c0_12] : memref<6x128xf32, #tpu.memory_space<vmem>>, vector<6x128xf32>
      %cst_13 = arith.constant dense<0.000000e+00> : vector<16x128xf32>
      %19 = tpu.matmul %17, %18, %cst_13 {dimension_numbers = #tpu.dot_dimension_numbers<[1], [0], [0], [1], [0, 0, 1, 1], [], []>} : vector<16x6xf32>, vector<6x128xf32>, vector<16x128xf32> -> vector<16x128xf32>
      %c0_14 = arith.constant 0 : index
      %c0_15 = arith.constant 0 : index
      %20 = vector.load %arg12[%c0_14, %c0_15] : memref<1x128xf32, #tpu.memory_space<vmem>>, vector<1x128xf32>
      %21 = vector.broadcast %20 : vector<1x128xf32> to vector<16x128xf32>
      %22 = arith.addf %19, %21 : vector<16x128xf32>
      %cst_16 = arith.constant 0.000000e+00 : f32
      %23 = vector.broadcast %cst_16 : f32 to vector<16x128xf32>
      %24 = arith.maximumf %22, %23 : vector<16x128xf32>
      %c0_17 = arith.constant 0 : index
      %c0_18 = arith.constant 0 : index
      %25 = vector.load %arg13[%c0_17, %c0_18] : memref<128x64xf32, #tpu.memory_space<vmem>>, vector<128x64xf32>
      %cst_19 = arith.constant dense<0.000000e+00> : vector<16x64xf32>
      %26 = tpu.matmul %24, %25, %cst_19 {dimension_numbers = #tpu.dot_dimension_numbers<[1], [0], [0], [1], [0, 0, 1, 1], [], []>} : vector<16x128xf32>, vector<128x64xf32>, vector<16x64xf32> -> vector<16x64xf32>
      %c0_20 = arith.constant 0 : index
      %c0_21 = arith.constant 0 : index
      %27 = vector.load %arg14[%c0_20, %c0_21] : memref<1x64xf32, #tpu.memory_space<vmem>>, vector<1x64xf32>
      %28 = vector.broadcast %27 : vector<1x64xf32> to vector<16x64xf32>
      %29 = arith.addf %26, %28 : vector<16x64xf32>
      %cst_22 = arith.constant 0.000000e+00 : f32
      %30 = vector.broadcast %cst_22 : f32 to vector<16x64xf32>
      %31 = arith.maximumf %29, %30 : vector<16x64xf32>
      %c0_23 = arith.constant 0 : index
      %c0_24 = arith.constant 0 : index
      %32 = vector.load %arg8[%c0_23, %c0_24] : memref<2x16xf32, #tpu.memory_space<vmem>>, vector<2x16xf32>
      %cst_25 = arith.constant dense<0.000000e+00> : vector<2x64xf32>
      %33 = tpu.matmul %32, %31, %cst_25 {dimension_numbers = #tpu.dot_dimension_numbers<[1], [0], [0], [1], [0, 0, 1, 1], [], []>} : vector<2x16xf32>, vector<16x64xf32>, vector<2x64xf32> -> vector<2x64xf32>
      %c0_26 = arith.constant 0 : index
      %c0_27 = arith.constant 0 : index
      %34 = vector.load %arg15[%c0_26, %c0_27] : memref<64x2xf32, #tpu.memory_space<vmem>>, vector<64x2xf32>
      %cst_28 = arith.constant dense<0.000000e+00> : vector<2x2xf32>
      %35 = tpu.matmul %33, %34, %cst_28 {dimension_numbers = #tpu.dot_dimension_numbers<[1], [0], [0], [1], [0, 0, 1, 1], [], []>} : vector<2x64xf32>, vector<64x2xf32>, vector<2x2xf32> -> vector<2x2xf32>
      %c0_29 = arith.constant 0 : index
      %c0_30 = arith.constant 0 : index
      %36 = vector.load %arg16[%c0_29, %c0_30] : memref<1x2xf32, #tpu.memory_space<vmem>>, vector<1x2xf32>
      %37 = vector.broadcast %36 : vector<1x2xf32> to vector<2x2xf32>
      %38 = arith.addf %35, %37 : vector<2x2xf32>
      %cst_31 = arith.constant dense<0xFF800000> : vector<2xf32>
      %39 = vector.multi_reduction <maximumf>, %38, %cst_31 [1] : vector<2x2xf32> to vector<2xf32>
      %40 = vector.shape_cast %39 : vector<2xf32> to vector<2x1xf32>
      %41 = vector.broadcast %40 : vector<2x1xf32> to vector<2x2xf32>
      %42 = arith.subf %38, %41 : vector<2x2xf32>
      %43 = math.exp %42 : vector<2x2xf32>
      %cst_32 = arith.constant dense<0.000000e+00> : vector<2xf32>
      %44 = vector.multi_reduction <add>, %43, %cst_32 [1] : vector<2x2xf32> to vector<2xf32>
      %45 = vector.shape_cast %44 : vector<2xf32> to vector<2x1xf32>
      %46 = math.log %45 : vector<2x1xf32>
      %47 = vector.broadcast %46 : vector<2x1xf32> to vector<2x2xf32>
      %48 = arith.subf %42, %47 : vector<2x2xf32>
      %c0_33 = arith.constant 0 : index
      %c0_34 = arith.constant 0 : index
      %49 = vector.load %arg17[%c0_33, %c0_34] : memref<2x2xf32, #tpu.memory_space<vmem>>, vector<2x2xf32>
      tpu.vector_store %arg17[%c0_33, %c0_34], %48 {strides = array<i32>} : memref<2x2xf32, #tpu.memory_space<vmem>>, vector<2x2xf32>,
    } else {
    }
    return
  }
  func.func @transform_0(%arg0: i32) -> (i32, i32) {
    %c0_i32 = arith.constant 0 : i32
    %c0_i32_0 = arith.constant 0 : i32
    %c0_i32_1 = arith.constant 0 : i32
    return %c0_i32, %c0_i32_0 : i32, i32
  }
  func.func @transform_1(%arg0: i32) -> (i32, i32) {
    %c0_i32 = arith.constant 0 : i32
    %c0_i32_0 = arith.constant 0 : i32
    %c0_i32_1 = arith.constant 0 : i32
    return %c0_i32, %c0_i32_0 : i32, i32
  }
  func.func @transform_2(%arg0: i32) -> (i32, i32) {
    %c0_i32 = arith.constant 0 : i32
    %c0_i32_0 = arith.constant 0 : i32
    %c0_i32_1 = arith.constant 0 : i32
    return %c0_i32, %c0_i32_0 : i32, i32
  }
  func.func @transform_3(%arg0: i32) -> (i32, i32) {
    %c0_i32 = arith.constant 0 : i32
    %c0_i32_0 = arith.constant 0 : i32
    %c0_i32_1 = arith.constant 0 : i32
    return %c0_i32, %c0_i32_0 : i32, i32
  }
  func.func @transform_4(%arg0: i32) -> (i32, i32) {
    %c0_i32 = arith.constant 0 : i32
    %c0_i32_0 = arith.constant 0 : i32
    return %c0_i32, %arg0 : i32, i32
  }
  func.func @transform_5(%arg0: i32) -> (i32, i32) {
    %c0_i32 = arith.constant 0 : i32
    %c0_i32_0 = arith.constant 0 : i32
    return %c0_i32, %arg0 : i32, i32
  }
  func.func @transform_6(%arg0: i32) -> (i32, i32) {
    %c0_i32 = arith.constant 0 : i32
    %c0_i32_0 = arith.constant 0 : i32
    return %c0_i32, %arg0 : i32, i32
  }
  func.func @transform_7(%arg0: i32) -> (i32, i32) {
    %c0_i32 = arith.constant 0 : i32
    %c0_i32_0 = arith.constant 0 : i32
    %c0_i32_1 = arith.constant 0 : i32
    return %c0_i32, %c0_i32_0 : i32, i32
  }
  func.func @transform_8(%arg0: i32) -> (i32, i32) {
    %c0_i32 = arith.constant 0 : i32
    %c0_i32_0 = arith.constant 0 : i32
    %c0_i32_1 = arith.constant 0 : i32
    return %c0_i32, %c0_i32_0 : i32, i32
  }
  func.func @transform_9(%arg0: i32) -> (i32, i32) {
    %c0_i32 = arith.constant 0 : i32
    %c0_i32_0 = arith.constant 0 : i32
    %c0_i32_1 = arith.constant 0 : i32
    return %c0_i32, %c0_i32_0 : i32, i32
  }
  func.func @transform_10(%arg0: i32) -> (i32, i32) {
    %c0_i32 = arith.constant 0 : i32
    %c0_i32_0 = arith.constant 0 : i32
    %c0_i32_1 = arith.constant 0 : i32
    return %c0_i32, %c0_i32_0 : i32, i32
  }
  func.func @transform_11(%arg0: i32) -> (i32, i32) {
    %c0_i32 = arith.constant 0 : i32
    %c0_i32_0 = arith.constant 0 : i32
    %c0_i32_1 = arith.constant 0 : i32
    return %c0_i32, %c0_i32_0 : i32, i32
  }
  func.func @transform_12(%arg0: i32) -> (i32, i32) {
    %c0_i32 = arith.constant 0 : i32
    %c0_i32_0 = arith.constant 0 : i32
    %c0_i32_1 = arith.constant 0 : i32
    return %c0_i32, %c0_i32_0 : i32, i32
  }
  func.func @transform_13(%arg0: i32) -> (i32, i32) {
    %c0_i32 = arith.constant 0 : i32
    %c0_i32_0 = arith.constant 0 : i32
    %c0_i32_1 = arith.constant 0 : i32
    return %c0_i32, %c0_i32_0 : i32, i32
  }
  func.func @transform_14(%arg0: i32) -> (i32, i32) {
    %c0_i32 = arith.constant 0 : i32
    %c0_i32_0 = arith.constant 0 : i32
    %c0_i32_1 = arith.constant 0 : i32
    return %c0_i32, %c0_i32_0 : i32, i32
  }
  func.func @transform_15(%arg0: i32) -> (i32, i32) {
    %c0_i32 = arith.constant 0 : i32
    %c0_i32_0 = arith.constant 0 : i32
    %c0_i32_1 = arith.constant 0 : i32
    return %c0_i32, %c0_i32_0 : i32, i32
  }
  func.func @transform_16(%arg0: i32) -> (i32, i32) {
    %c0_i32 = arith.constant 0 : i32
    %c0_i32_0 = arith.constant 0 : i32
    %c0_i32_1 = arith.constant 0 : i32
    return %c0_i32, %c0_i32_0 : i32, i32
  }
}

</mosaic_0001>

<bundles_post_ra>
// kernel: tpu_custom_call.1
= control target key start
LH: loop header
LB: loop body
LE: loop exit
PB: predicated region body
PF: predicated region fallthrough
CT: control target
= control target key end

     0   :  { %s1403_s0 = inlined_call_operand.<no memory space> [shape: s32[1,1], index: 0, kind: input, shape index: {}]   ;;  %s1404_s1 = inlined_call_operand.<no memory space> [shape: f32[1,1], index: 1, kind: input, shape index: {}]   ;;  %s1405_s2 = inlined_call_operand.vmem [shape: f32[6,16], index: 2, kind: input, shape index: {}]   ;;  %s1406_s3 = inlined_call_operand.vmem [shape: f32[16,6], index: 3, kind: input, shape index: {}]   ;;  %s1407_s4 = inlined_call_operand.vmem [shape: s32[1,512], index: 4, kind: input, shape index: {}]   ;;  %s1408_s5 = inlined_call_operand.vmem [shape: s32[1,512], index: 5, kind: input, shape index: {}]   ;;  %s1409_s6 = inlined_call_operand.vmem [shape: f32[1,512], index: 6, kind: input, shape index: {}]   ;;  %s1410_s7 = inlined_call_operand.vmem [shape: f32[2,16], index: 7, kind: input, shape index: {}]   ;;  %s1411_s8 = inlined_call_operand.vmem [shape: f32[6,1], index: 8, kind: input, shape index: {}]   ;;  %s1412_s9 = inlined_call_operand.vmem [shape: f32[6,1], index: 9, kind: input, shape index: {}]   ;;  %s1413_s10 = inlined_call_operand.vmem [shape: f32[6,128], index: 10, kind: input, shape index: {}]   ;;  %s1414_s11 = inlined_call_operand.vmem [shape: f32[1,128], index: 11, kind: input, shape index: {}]   ;;  %s1415_s12 = inlined_call_operand.vmem [shape: f32[128,64], index: 12, kind: input, shape index: {}]   ;;  %s1416_s13 = inlined_call_operand.vmem [shape: f32[1,64], index: 13, kind: input, shape index: {}]   ;;  %s1417_s14 = inlined_call_operand.vmem [shape: f32[64,2], index: 14, kind: input, shape index: {}]   ;;  %s1418_s15 = inlined_call_operand.vmem [shape: f32[1,2], index: 15, kind: input, shape index: {}]   ;;  %s1419_s16 = inlined_call_operand.hbm [shape: f32[2,2], index: 16, kind: output, shape index: {}]  }
   0x1   :  { %1420 = sst [smem:[#allocation8_spill]] %s1403_s0 }
   0x2   :  { %22 = sst [smem:[#allocation4]] %s1404_s1 }
   0x3   :  { %23 = vsyncpa [#allocation6], 0  ;;  %vm60_vm0 = vcmask 48128   ;;  %v1141_v0 = vmov 0.0   ;;  %s1421_s25 = sld [smem:[#allocation8_spill]] }
   0x4   :  { %61 = vst.msk [vmem:[#allocation2] sm:$0xff] %vm60_vm0, %v1141_v0  ;;  %62 = vst.msk [vmem:[#allocation2 + $0x8] sm:$0xff] %vm60_vm0, %v1141_v0 }
   0x9   :  { %p907_p0 = scmp.le.s32.totalorder %s1421_s25, 0 }
   0xa   :  { %v69_v1 = vlaneseq (!%p907_p0)  ;;  %v1142_v2 = vmov (!%p907_p0), 0.0   ;;  %v155_v3 = vld [vmem:[%s1411_s8] sm:$0x3f] (!%p907_p0)  ;;  %v1143_v5 = vmov (!%p907_p0), 0   ;;  %v1144_v17 = vmov (!%p907_p0), 1.0|1.0  }
   0xb   :  { %68 = sbr.rel (%p907_p0) target bundleno = 468 (0x1d4), region = 73  ;;  %265 = vmatprep.mubr.f32.mxu0 (!%p907_p0), %v1142_v2  ;;  %336 = vmatprep.mubr.f32.mxu1 (!%p907_p0), %v1142_v2  ;;  %v72_v6 = vld [vmem:[%s1407_s4] sm:$0xf] (!%p907_p0)  ;;  %vm197_vm13 = vcmask (!%p907_p0), 130048   ;;  %v1145_v22 = vmov (!%p907_p0), 1.0   ;;  %v348_v60 = vld [vmem:[#allocation2 + $0x8] sm:$0xff] (!%p907_p0) }
   0xc   :  { %v1247_v4 = vshrl.u32 (!%p907_p0), %v69_v1, 7  ;;  %1112 = vset.pattern.permute.xlu0 (!%p907_p0), %v1143_v5  ;;  %v187_v11 = vld [vmem:[%s1412_s9] sm:$0x3f] (!%p907_p0) }
   0xd   :  { %159 = vperm.xlu0 (!%p907_p0), %1112, %v155_v3   ;;  %v154_v18 = vld [vmem:[%s1405_s2] sm:$0x3f] (!%p907_p0) }
   0xe   :  { %v1253_v7 = vadd.s32 (!%p907_p0), 8, %v1247_v4  ;;  %v79_v8 = vsub.s32 (!%p907_p0), 1, %v1247_v4  ;;  %v87_v9 = vsub.s32 (!%p907_p0), 3, %v1247_v4  ;;  %v75_v10 = vsub.s32 (!%p907_p0), 0, %v1247_v4  ;;  %v113_v19 = vld [vmem:[%s1408_s5] sm:$0xf] (!%p907_p0) }
   0xf   :  { %v83_v12 = vsub.s32 (!%p907_p0), 2, %v1247_v4  ;;  %v156_v23 = vld [vmem:[%s1409_s6] sm:$0xf] (!%p907_p0) }
  0x10   :  { %v80_v13 = vrot.slane (!%p907_p0), %v72_v6, %v79_v8  ;;  %v88_v14 = vrot.slane (!%p907_p0), %v72_v6, %v87_v9  ;;  %v76_v15 = vrot.slane (!%p907_p0), %v72_v6, %v75_v10  ;;  %v121_v20 = vrot.slane (!%p907_p0), %v113_v19, %v79_v8  ;;  %v347_v53 = vld [vmem:[#allocation2] sm:$0xff] (!%p907_p0) }
  0x11   :  { %v84_v16 = vrot.slane (!%p907_p0), %v72_v6, %v83_v12  ;;  %190 = vperm.xlu0 (!%p907_p0), %1112, %v187_v11   ;;  %v129_v21 = vrot.slane (!%p907_p0), %v113_v19, %v87_v9  ;;  %v166_v25 = vrot.slane (!%p907_p0), %v156_v23, %v75_v10  ;;  %v174_v26 = vrot.slane (!%p907_p0), %v156_v23, %v83_v12 }
  0x12   :  { %vm90_vm1 = vcmp.eq.s32.totalorder %v1247_v4, %v80_v13  ;;  %vm94_vm2 = vcmp.eq.s32.totalorder %v1253_v7, %v80_v13  ;;  %vm92_vm3 = vcmp.eq.s32.totalorder %v1247_v4, %v88_v14  ;;  %vm96_vm4 = vcmp.eq.s32.totalorder %v1253_v7, %v88_v14 }
  0x13   :  { %vm1049_vm5 = vmpackc.low %vm94_vm2, %vm90_vm1  ;;  %vm89_vm6 = vcmp.eq.s32.totalorder %v1247_v4, %v76_v15  ;;  %vm93_vm7 = vcmp.eq.s32.totalorder %v1253_v7, %v76_v15  ;;  %vm91_vm8 = vcmp.eq.s32.totalorder %v1247_v4, %v84_v16  ;;  %vm95_vm9 = vcmp.eq.s32.totalorder %v1253_v7, %v84_v16 }
  0x14   :  { %1050 = vmatprep.subr.msk.bf16.mxu0 %vm1049_vm5, %v1144_v17  ;;  %vm1053_vm10 = vmpackc.low %vm96_vm4, %vm92_vm3  ;;  %vm131_vm14 = vcmp.eq.s32.totalorder %v1247_v4, %v121_v20  ;;  %vm133_vm15 = vcmp.eq.s32.totalorder %v1247_v4, %v129_v21  ;;  %v170_v27 = vrot.slane %v156_v23, %v79_v8  ;;  %v178_v28 = vrot.slane %v156_v23, %v87_v9 }
  0x15   :  { %1054 = vmatprep.subr.msk.bf16.mxu1 %vm1053_vm10, %v1144_v17  ;;  %vm1051_vm11 = vmpackc.low %vm93_vm7, %vm89_vm6  ;;  %v117_v46 = vrot.slane %v113_v19, %v75_v10  ;;  %v125_v48 = vrot.slane %v113_v19, %v83_v12  ;;  %vm135_vm3 = vcmp.eq.s32.totalorder %v1253_v7, %v121_v20  ;;  %vm137_vm4 = vcmp.eq.s32.totalorder %v1253_v7, %v129_v21 }
  0x16   :  { %1052 = vmatpush1.bf16.msk.msra.mxu0 %vm1051_vm11, %v1144_v17  ;;  %vm1055_vm12 = vmpackc.low %vm95_vm9, %vm91_vm8 }
  0x17   :  { %1056 = vmatpush1.bf16.msk.msra.mxu1 %vm1055_vm12, %v1144_v17  ;;  %vm130_vm1 = vcmp.eq.s32.totalorder %v1247_v4, %v117_v46  ;;  %vm132_vm2 = vcmp.eq.s32.totalorder %v1247_v4, %v125_v48  ;;  %vm134_vm5 = vcmp.eq.s32.totalorder %v1253_v7, %v117_v46  ;;  %vm136_vm6 = vcmp.eq.s32.totalorder %v1253_v7, %v125_v48 }
  0x19   :  { %928 = vmatmul.mubr.msk.f32.vlgmr.msra.gmra.mrb[0].mxu0 %vm197_vm13, %v154_v18 }
  0x1a   :  { %933 = vmatmul.mubr.msk.f32.vlgmr.msra.gmra.mrb[0].mxu1 %vm197_vm13, %v154_v18  ;;  %934 = vmatprep.mubr.msk.f32.mxu0 %vm131_vm14, %v1145_v22 }
  0x1b   :  { %938 = vmatprep.mubr.msk.f32.mxu1 %vm133_vm15, %v1145_v22 }
  0x8c   :  { %v160_v24 = vpop.permute.xlu0 %159 }
  0x8d   :  { %v183_v29 = vmul.f32 %v166_v25, %v160_v24  ;;  %v185_v31 = vmul.f32 %v174_v26, %v160_v24  ;;  %v184_v32 = vmul.f32 %v170_v27, %v160_v24  ;;  %v186_v33 = vmul.f32 %v178_v28, %v160_v24 }
  0x90   :  { %v191_v30 = vpop.permute.xlu0 %190 }
  0x91   :  { %v193_v34 = vadd.f32 %v191_v30, %v183_v29  ;;  %v195_v36 = vadd.f32 %v191_v30, %v185_v31  ;;  %v194_v37 = vadd.f32 %v191_v30, %v184_v32  ;;  %v196_v41 = vadd.f32 %v191_v30, %v186_v33 }
  0xec   :  { %v267_v35 = vpop.f32.mrb[0].mxu0 }
  0xed   :  { %v268_v38 = vadd.f32 %v267_v35, %v193_v34  ;;  %v338_v39 = vpop.f32.mrb[0].mxu1  ;;  %v269_v40 = vpop.f32.mrb[1].mxu0 }
  0xee   :  { %v339_v42 = vadd.f32 %v338_v39, %v195_v36  ;;  %v270_v43 = vadd.f32 %v269_v40, %v194_v37  ;;  %v340_v44 = vpop.f32.mrb[1].mxu1 }
  0xef   :  { %v341_v45 = vadd.f32 %v340_v44, %v196_v41  ;;  %v343_v49 = vmax.f32 %v268_v38, 0.0 }
  0xf0   :  { %v344_v47 = vmax.f32 %v270_v43, 0.0  ;;  %v345_v51 = vmax.f32 %v339_v42, 0.0 }
  0xf1   :  { %v346_v50 = vmax.f32 %v341_v45, 0.0 }
  0xf2   :  { %349 = vmatprep.subr.mxu0 %v344_v47 }
  0xf3   :  { %424 = vmatprep.subr.mxu1 %v346_v50  ;;  %350 = vmatpush1.xpose.msra.mxu0 %v343_v49 }
  0xf4   :  { %425 = vmatpush1.xpose.msra.mxu1 %v345_v51 }
  0xf6   :  { %935 = vmatmul.mubr.msk.f32.vlgmr.msra.gmra.mrb[2].mxu0 %vm130_vm1, %v1145_v22 }
  0xf7   :  { %939 = vmatmul.mubr.msk.f32.vlgmr.msra.gmra.mrb[2].mxu1 %vm132_vm2, %v1145_v22  ;;  %936 = vmatprep.mubr.msk.f32.mxu0 %vm135_vm3, %v1145_v22 }
  0xf8   :  { %940 = vmatprep.mubr.msk.f32.mxu1 %vm137_vm4, %v1145_v22 }
  0xfa   :  { %937 = vmatmul.mubr.msk.f32.gmra.mrb[4].mxu0 %vm134_vm5, %v1145_v22 }
  0xfb   :  { %941 = vmatmul.mubr.msk.f32.gmra.mrb[4].mxu1 %vm136_vm6, %v1145_v22 }
 0x1c9   :  { %v415_v52 = vpop.f32.mrb[2].mxu0 }
 0x1ca   :  { %v490_v54 = vpop.f32.mrb[2].mxu1  ;;  %v417_v55 = vpop.f32.mrb[3].mxu0 }
 0x1cb   :  { %v491_v56 = vadd.f32 %v490_v54, %v415_v52  ;;  %v492_v57 = vpop.f32.mrb[3].mxu1 }
 0x1cd   :  { %v499_v58 = vadd.f32 %v491_v56, %v347_v53  ;;  %v420_v59 = vpop.f32.mrb[4].mxu0 }
 0x1ce   :  { %v495_v61 = vpop.f32.mrb[4].mxu1  ;;  %v422_v62 = vpop.f32.mrb[5].mxu0 }
 0x1cf   :  { %502 = vst.msk [vmem:[#allocation2] sm:$0xff] %vm60_vm0, %v499_v58  ;;  %v496_v63 = vadd.f32 %v495_v61, %v420_v59  ;;  %v497_v1 = vpop.f32.mrb[5].mxu1 }
 0x1d1   :  { %v500_v2 = vadd.f32 %v496_v63, %v348_v60 }
 0x1d3   :  { %503 = vst.msk [vmem:[#allocation2 + $0x8] sm:$0xff] %vm60_vm0, %v500_v2 }
 0x1d4 PF:  { %v518_v3 = vld [vmem:[%s1413_s10] sm:$0x3f]  ;;  %vm533_vm7 = vcmask 1045504   ;;  %s507_s6 = sld [smem:[#allocation4]]  ;;  %v615_v5 = vld [vmem:[%s1415_s12 + $0x8] sm:$0xff]  ;;  %v616_v6 = vld [vmem:[%s1415_s12 + $0x10] sm:$0xff] }
 0x1d5   :  { %983 = vmatprep.subr.msk.mxu0 %vm533_vm7, %v518_v3  ;;  %v614_v4 = vld [vmem:[%s1415_s12] sm:$0xff]  ;;  %v617_v8 = vld [vmem:[%s1415_s12 + $0x18] sm:$0xff]  ;;  %v619_v11 = vld [vmem:[%s1415_s12 + $0x28] sm:$0xff]  ;;  %v1146_v44 = vmov 0.0|0.0   ;;  %vm715_vm8 = vcmask 130048   ;;  %vm804_vm9 = vcmask 523264  }
 0x1d6   :  { %984 = vmatpush3.msk.msra.mxu0 %vm533_vm7, %v518_v3  ;;  %v1057_v7 = vpack.c.bf16 %v615_v5, %v614_v4  ;;  %v1061_v9 = vpack.c.bf16 %v617_v8, %v616_v6  ;;  %v618_v10 = vld [vmem:[%s1415_s12 + $0x20] sm:$0xff]  ;;  %v510_v13 = vld [vmem:[%s1406_s3 + $0x8] sm:$0xff]  ;;  %v620_v18 = vld [vmem:[%s1415_s12 + $0x30] sm:$0xff]  ;;  %vm878_vm10 = vcmask 9216  }
 0x1d7   :  { %v509_v12 = vld [vmem:[%s1406_s3] sm:$0xff]  ;;  %v1065_v15 = vpack.c.bf16 %v619_v11, %v618_v10  ;;  %v621_v19 = vld [vmem:[%s1415_s12 + $0x38] sm:$0xff]  ;;  %v623_v26 = vld [vmem:[%s1415_s12 + $0x48] sm:$0xff]  ;;  %1089 = vmatprep.subr.bf16.mxu0 %v1146_v44 }
 0x1d8   :  { %1058 = vmatprep.subr.bf16.mxu1 %v1057_v7  ;;  %v514_v14 = vld [vmem:[#allocation2] sm:$0xff]  ;;  %v1069_v24 = vpack.c.bf16 %v621_v19, %v620_v18  ;;  %v624_v28 = vld [vmem:[%s1415_s12 + $0x50] sm:$0xff]  ;;  %v625_v29 = vld [vmem:[%s1415_s12 + $0x58] sm:$0xff] }
 0x1d9   :  { %1060 = vmatpush3.bf16.msra.mxu1 %v1057_v7  ;;  %v622_v25 = vld [vmem:[%s1415_s12 + $0x40] sm:$0xff]  ;;  %v1077_v30 = vpack.c.bf16 %v625_v29, %v624_v28  ;;  %v627_v32 = vld [vmem:[%s1415_s12 + $0x68] sm:$0xff]  ;;  %v628_v34 = vld [vmem:[%s1415_s12 + $0x70] sm:$0xff] }
 0x1da   :  { %s508_s29 = sadd.f32 1.0, %s507_s6  ;;  %1062 = vmatprep.subr.bf16.mxu1 %v1061_v9  ;;  %v515_v17 = vld [vmem:[#allocation2 + $0x8] sm:$0xff]  ;;  %v1073_v27 = vpack.c.bf16 %v623_v26, %v622_v25  ;;  %v626_v31 = vld [vmem:[%s1415_s12 + $0x60] sm:$0xff]  ;;  %v629_v35 = vld [vmem:[%s1415_s12 + $0x78] sm:$0xff] }
 0x1db   :  { %v1081_v33 = vpack.c.bf16 %v627_v32, %v626_v31  ;;  %v1085_v36 = vpack.c.bf16 %v629_v35, %v628_v34  ;;  %v942_v37 = vld [vmem:[%s1414_s11] ss:$0 sm:$0xff]  ;;  %v790_v53 = vld [vmem:[%s1417_s14 + $0x8] sm:$0xff]  ;;  %v791_v57 = vld [vmem:[%s1417_s14 + $0x10] sm:$0xff] }
 0x1dc   :  { %v511_v16 = vstv %s508_s29  ;;  %v946_v45 = vld [vmem:[%s1416_s13] ss:$0 sm:$0xff]  ;;  %v792_v58 = vld [vmem:[%s1417_s14 + $0x18] sm:$0xff]  ;;  %v794_v61 = vld [vmem:[%s1417_s14 + $0x28] sm:$0xff] }
 0x1dd   :  { %v512_v20 = vmul.f32 %v511_v16, %v509_v12  ;;  %v513_v21 = vmul.f32 %v511_v16, %v510_v13  ;;  %1064 = vmatpush3.bf16.msra.mxu1 %v1061_v9  ;;  %v789_v52 = vld [vmem:[%s1417_s14] sm:$0xff]  ;;  %v1096_v59 = vpack.c.bf16 %v792_v58, %v791_v57  ;;  %v795_v63 = vld [vmem:[%s1417_s14 + $0x30] sm:$0xff] }
 0x1de   :  { %1066 = vmatprep.subr.bf16.mxu1 %v1065_v15  ;;  %v714_v55 = vld [vmem:[%s1410_s7] sm:$0x3]  ;;  %v1093_v56 = vpack.c.bf16 %v790_v53, %v789_v52 }
 0x1df   :  { %v516_v22 = vadd.f32 %v514_v14, %v512_v20  ;;  %v517_v23 = vadd.f32 %v515_v17, %v513_v21  ;;  %v793_v60 = vld [vmem:[%s1417_s14 + $0x20] sm:$0xff] }
 0x1e0   :  { %v1099_v62 = vpack.c.bf16 %v794_v61, %v793_v60  ;;  %v948_v4 = vld [vmem:[%s1418_s15] ss:$0 sm:$0xff] }
 0x1e1   :  { %985 = vmatprep.mubr.msk.f32.mxu0 %vm60_vm0, %v516_v22  ;;  %1068 = vmatpush3.bf16.msra.mxu1 %v1065_v15 }
 0x1e2   :  { %986 = vmatmul.mubr.msk.f32.vlgmr.msra.gmra.mrb[0].mxu0 %vm60_vm0, %v517_v23  ;;  %1070 = vmatprep.subr.bf16.mxu1 %v1069_v24  ;;  %vm1147_vm0 = vmmov 0  }
 0x1e3   :  { %1027 = vmatprep.mubr.msk.f32.mxu0 %vm1147_vm0, %v1141_v0 }
 0x1e5   :  { %1072 = vmatpush3.bf16.msra.mxu1 %v1069_v24 }
 0x1e6   :  { %1074 = vmatprep.subr.bf16.mxu1 %v1073_v27 }
 0x1e9   :  { %1076 = vmatpush3.bf16.msra.mxu1 %v1073_v27 }
 0x1ea   :  { %1078 = vmatprep.subr.bf16.mxu1 %v1077_v30 }
 0x1ed   :  { %1080 = vmatpush3.bf16.msra.mxu1 %v1077_v30 }
 0x1ee   :  { %1082 = vmatprep.subr.bf16.mxu1 %v1081_v33 }
 0x1f1   :  { %1084 = vmatpush3.bf16.msra.mxu1 %v1081_v33 }
 0x1f2   :  { %1086 = vmatprep.subr.bf16.mxu1 %v1085_v36 }
 0x1f5   :  { %1088 = vmatpush3.bf16.msra.mxu1 %v1085_v36 }
 0x2b5   :  { %v987_v38 = vpop.f32.mrb[0].mxu0 }
 0x2b6   :  { %v609_v39 = vadd.f32 %v987_v38, %v942_v37  ;;  %v603_v40 = vpop.f32.mrb[1].mxu0 }
 0x2b7   :  { %v604_v41 = vadd.f32 %v942_v37, %v603_v40 }
 0x2b8   :  { %v613_v43 = vmax.f32 %v609_v39, 0.0 }
 0x2b9   :  { %v612_v42 = vmax.f32 %v604_v41, 0.0 }
 0x2bb   :  { %1020 = vmatprep.mubr.f32.mxu1 %v612_v42 }
 0x2bc   :  { %1021 = vmatmul.mubr.f32.vlgmr.msra.gmra.mrb[0].mxu1 %v613_v43 }
 0x38f   :  { %v1022_v46 = vpop.f32.mrb[0].mxu1 }
 0x390   :  { %v709_v47 = vadd.f32 %v1022_v46, %v946_v45  ;;  %v703_v48 = vpop.f32.mrb[1].mxu1 }
 0x391   :  { %v704_v49 = vadd.f32 %v946_v45, %v703_v48 }
 0x392   :  { %v713_v50 = vmax.f32 %v709_v47, 0.0 }
 0x393   :  { %v712_v51 = vmax.f32 %v704_v49, 0.0 }
 0x395   :  { %v1090_v54 = vpack.c.bf16 %v713_v50, %v712_v51 }
 0x397   :  { %1091 = vmatpush3.bf16.msra.mxu0 %v1090_v54 }
 0x398   :  { %1092 = vmatprep.subr.bf16.mxu0 %v1146_v44 }
 0x39a   :  { %1028 = vmatmul.mubr.msk.f32.vlgmr.msra.gmra.mrb[2].mxu0 %vm715_vm8, %v714_v55 }
 0x39b   :  { %1094 = vmatpush3.bf16.msra.mxu0 %v1093_v56  ;;  %1046 = vmatprep.mubr.msk.f32.mxu0 %vm1147_vm0, %v1141_v0  ;;  %v796_v0 = vld [vmem:[%s1417_s14 + $0x38] sm:$0xff]  ;;  %s1148_s14 = smov [#allocation5]  }
 0x39c   :  { %1095 = vmatprep.subr.bf16.mxu0 %v1146_v44  ;;  %v1102_v1 = vpack.c.bf16 %v796_v0, %v795_v63  ;;  %s898_s15 = sshll.u32 %s1148_s14, 4  ;;  %s899_s15 = int_to_ptr.vmem [resolvable:$true] %s898_s15 }
 0x39d   :  { %s1117_s1 = scalar_lea.vmem %s899_s15, 32  ;;  %p1122_p2 = scmp.lt.s32.totalorder %s899_s15, %s899_s15 }
 0x39e   :  { %p1118_p1 = scmp.ne.s32.totalorder %s899_s15, %s1117_s1  ;;  %p1123_p3 = scmp.lt.s32.totalorder %s1117_s1, %s1117_s1 }
 0x39f   :  { %1097 = vmatpush3.bf16.msra.mxu0 %v1096_v59 }
 0x3a0   :  { %1098 = vmatprep.subr.bf16.mxu0 %v1146_v44  ;;  %p1124_p4 = por %p1123_p3, %p1122_p2 }
 0x3a2   :  { %p1125_p5 = pnand %p1124_p4, %p1118_p1 }
 0x3a3   :  { %1100 = vmatpush3.bf16.msra.mxu0 %v1099_v62 }
 0x3a4   :  { %1101 = vmatprep.subr.bf16.mxu0 %v1146_v44 }
 0x3a7   :  { %1103 = vmatpush3.bf16.msra.mxu0 %v1102_v1 }
 0x46d   :  { %v785_v2 = vpop.f32.mrb[2].mxu0 }
 0x46e   :  { %v1029_v3 = vpop.f32.mrb[3].mxu0  ;;  %1047 = vmatmul.mubr.msk.f32.vlgmr.msra.gmra.mrb[4].mxu0 %vm804_vm9, %v785_v2 }
 0x541   :  { %v874_v5 = vpop.f32.mrb[4].mxu0 }
 0x542   :  { %v875_v6 = vadd.f32 %v948_v4, %v874_v5  ;;  %v1048_v7 = vpop.f32.mrb[5].mxu0 }
 0x544   :  { %v879_v8 = vsel %vm878_vm10, %v875_v6, -inf }
 0x545   :  { %880 = vmax.xlane.f32.xlu0 %v879_v8 }
 0x5d2   :  { %v881_v9 = vpop.xlane.xlu0 %880 }
 0x5d3   :  { %v882_v10 = vsub.f32 %v875_v6, %v881_v9 }
 0x5d5   :  { %v883_v11 = vmul.f32 1.442695, %v882_v10 }
 0x5d7   :  { %1113 = vpow2.f32 %v883_v11 }
 0x5e1   :  { %v1114_v12 = vpop.eup %1113 }
 0x5e2   :  { %v885_v13 = vsel %vm878_vm10, %v1114_v12, 0.0 }
 0x5e3   :  { %886 = vadd.xlane.f32.xlu0 %v885_v13 }
 0x670   :  { %v887_v14 = vpop.xlane.xlu0 %886 }
 0x671   :  { %1115 = vlog2.f32 %v887_v14 }
 0x67b   :  { %v1116_v15 = vpop.eup %1115 }
 0x67c   :  { %v889_v16 = vmul.f32 0.6931472, %v1116_v15 }
 0x67e   :  { %v890_v17 = vsub.f32 %v882_v10, %v889_v16 }
 0x680   :  { %891 = vst.msk [vmem:[#allocation5] sm:$0x3] %vm878_vm10, %v890_v17 }
 0x681   :  { %1128 = shalt.err (!%p1125_p5)
}
 0x682   :  { %s1129_s29 = scalar_lea.hbm %s1419_s16, 32 }
 0x683   :  { %p1130_p6 = scmp.ne.s32.totalorder %s1419_s16, %s1129_s29  ;;  %p1133_p7 = scmp.lt.u32.totalorder %s1129_s29, %s1419_s16 }
 0x685   :  { %p1135_p8 = pnand %p1133_p7, %p1130_p6 }
 0x687   :  { %1138 = shalt.err (!%p1135_p8)
}
 0x688   :  { %901 = dma.vmem_to_hbm [thread:$0]  %s899_s15, 32, %s1419_s16, [#allocation6]  }
 0x689   :  { %1139 = dma.done.wait [#allocation6], 32  }
 0x68a   :  { %1140 = vsyncadd [#allocation6], 4294967264 }
 0x68b   :  { %905 = vsyncpa [#allocation6], 1 }

</bundles_post_ra>
